<compile_context>
chip_gen: v6e
topology: v6e:2x2x1
jax: 0.10.0
libtpu: 0.0.40
codegen_flags: <defaults>
</compile_context>

<pallas_src>
import functools

import jax
import jax.numpy as jnp
from jax.experimental import pallas as pl
from jax.experimental.pallas import tpu as pltpu

LANE = 128
VMEM_LIMIT = 32 * 1024 * 1024


def _round_up(x, m):
    return (x + m - 1) // m * m


# ----------------------------------------------------------------------------
# Pallas kernel 1: fused relation projection  Y_wide = X @ Wrel_cat
# ----------------------------------------------------------------------------
def _rel_proj_kernel(x_ref, w_ref, y_ref):
    y_ref[...] = jnp.dot(
        x_ref[...], w_ref[...], preferred_element_type=jnp.float32
    ).astype(y_ref.dtype)


def rel_projection(x, wrel_cat, *, tm, out_dtype):
    n, c_in = x.shape
    _, wr = wrel_cat.shape
    return pl.pallas_call(
        _rel_proj_kernel,
        out_shape=jax.ShapeDtypeStruct((n, wr), out_dtype),
        grid_spec=pltpu.PrefetchScalarGridSpec(
            num_scalar_prefetch=0,
            grid=(n // tm,),
            in_specs=[
                pl.BlockSpec((tm, c_in), lambda i: (i, 0)),
                pl.BlockSpec((c_in, wr), lambda i: (0, 0)),
            ],
            out_specs=pl.BlockSpec((tm, wr), lambda i: (i, 0)),
        ),
        compiler_params=pltpu.CompilerParams(
            dimension_semantics=("parallel",),
            vmem_limit_bytes=VMEM_LIMIT),
    )(x, wrel_cat)


# ----------------------------------------------------------------------------
# Pallas kernel 2: fused RGCN layer body (tiled over rows x contraction)
#   k==0    : acc  = X_exp @ Wroot_stack + bias        (all node types at once)
#   every k : acc += A_wide[:, k-tile] @ Y[k-tile, :]  (all relations at once)
#   k==last : out  = relu(acc) (optional) -> lane-dense (tm, Cp) store
# ----------------------------------------------------------------------------
def _rgcn_fused_kernel(aw_ref, y_ref, xexp_ref, wroot_ref, bias_ref,
                       out_ref, acc_ref, *, apply_relu):
    k = pl.program_id(1)

    @pl.when(k == 0)
    def _():
        acc_ref[...] = (
            jnp.dot(xexp_ref[...], wroot_ref[...],
                    preferred_element_type=jnp.float32)
            + bias_ref[...])

    acc_ref[...] += jnp.dot(aw_ref[...], y_ref[...],
                            preferred_element_type=jnp.float32)

    @pl.when(k == pl.num_programs(1) - 1)
    def _():
        res = acc_ref[...]
        if apply_relu:
            res = jnp.maximum(res, 0.0)
        out_ref[...] = res.astype(out_ref.dtype)


def rgcn_fused(a_wide, y_rs, x_exp, wroot_stack, bias, *, apply_relu, tm, tk):
    np_, kp = a_wide.shape
    tcin = x_exp.shape[1]
    cp = wroot_stack.shape[1]
    kernel = functools.partial(_rgcn_fused_kernel, apply_relu=apply_relu)
    return pl.pallas_call(
        kernel,
        out_shape=jax.ShapeDtypeStruct((np_, cp), jnp.float32),
        grid_spec=pltpu.PrefetchScalarGridSpec(
            num_scalar_prefetch=0,
            grid=(np_ // tm, kp // tk),
            in_specs=[
                pl.BlockSpec((tm, tk), lambda i, k: (i, k)),     # A_wide tile (bf16)
                pl.BlockSpec((tk, cp), lambda i, k: (k, 0)),     # Y tile
                pl.BlockSpec((tm, tcin), lambda i, k: (i, 0)),   # X_exp tile
                pl.BlockSpec((tcin, cp), lambda i, k: (0, 0)),   # stacked W_root
                pl.BlockSpec((tm, cp), lambda i, k: (i, 0)),     # per-node bias
            ],
            out_specs=pl.BlockSpec((tm, cp), lambda i, k: (i, 0)),
            scratch_shapes=[pltpu.VMEM((tm, cp), jnp.float32)],
        ),
        compiler_params=pltpu.CompilerParams(
            dimension_semantics=("parallel", "arbitrary"),
            vmem_limit_bytes=VMEM_LIMIT),
    )(a_wide, y_rs, x_exp, wroot_stack, bias)


# ----------------------------------------------------------------------------
# One RGCNConv layer (wrapper: layout plumbing + two pallas_calls)
# ----------------------------------------------------------------------------
def rgcn_conv_layer(a_wide, x, nt_onehot, w_rel, w_root, b_root, *,
                    apply_relu, a_dtype, tm, tk):
    np_, c_in = x.shape
    num_rel, c_out, _ = w_rel.shape
    num_nt = nt_onehot.shape[1]
    cp = _round_up(c_out, LANE)
    kp = a_wide.shape[1]

    # ---- wrapper-side layout plumbing (pre-transposed, stacked, lane-padded) ----
    wrel_pad = jnp.pad(w_rel, ((0, 0), (0, cp - c_out), (0, 0)))        # (R, Cp, Cin)
    wrel_cat = wrel_pad.transpose(2, 0, 1).reshape(c_in, num_rel * cp)  # (Cin, R*Cp)
    wroot_stack = w_root.transpose(0, 2, 1).reshape(num_nt * c_in, c_out)
    wroot_stack = jnp.pad(wroot_stack, ((0, 0), (0, cp - c_out)))       # (T*Cin, Cp)
    bias = jnp.pad(nt_onehot @ b_root.reshape(num_nt, c_out),
                   ((0, 0), (0, cp - c_out)))                           # (Np, Cp)
    x_exp = (nt_onehot[:, :, None] * x[:, None, :]).reshape(np_, num_nt * c_in)

    # ---- kernel 1: lane-dense relation projection ----
    y_wide = rel_projection(x, wrel_cat, tm=tm, out_dtype=a_dtype)      # (Np, R*Cp)
    y_rs = y_wide.reshape(np_ * num_rel, cp)                            # [m*R+r, c]
    y_rs = jnp.pad(y_rs, ((0, kp - np_ * num_rel), (0, 0)))             # (Kp, Cp)

    # ---- kernel 2: tiled aggregation + root + bias + relu ----
    out_pad = rgcn_fused(a_wide, y_rs, x_exp, wroot_stack, bias,
                         apply_relu=apply_relu, tm=tm, tk=tk)
    return out_pad[:, :c_out]


# ----------------------------------------------------------------------------
# Plain-JAX glue: graph structure -> dense normalized adjacency, group_input
# ----------------------------------------------------------------------------
def build_mean_adjacency(edge_index, edge_type, num_nodes, num_edge_types):
    """A[r, dst, src] = 1/deg_r(dst) for each edge of type r (PyG mean aggr)."""
    src, dst = edge_index[0], edge_index[1]
    a = jnp.zeros((num_edge_types, num_nodes, num_nodes), dtype=jnp.float32)
    a = a.at[edge_type, dst, src].add(1.0)
    deg = a.sum(axis=-1, keepdims=True)
    return a / jnp.maximum(deg, 1.0)


def group_input(x_dict, emb_dict, node_type, local_node_idx, in_channels):
    n = node_type.shape[0]
    h = jnp.zeros((n, in_channels), dtype=jnp.float32)
    for key, tbl in list(x_dict.items()) + list(emb_dict.items()):
        mask = (node_type == key)
        idx = jnp.clip(local_node_idx, 0, tbl.shape[0] - 1)
        h = jnp.where(mask[:, None], tbl[idx], h)
    return h


# ----------------------------------------------------------------------------
# Model: parameter init + forward
# ----------------------------------------------------------------------------
def init_rgcn_params(key, in_ch, hid_ch, out_ch, num_layers,
                     num_node_types, num_edge_types):
    dims = [(in_ch, hid_ch)]
    for _ in range(num_layers - 2):
        dims.append((hid_ch, hid_ch))
    dims.append((hid_ch, out_ch))

    params = []
    for (ci, co) in dims:
        key, k1, k2, k3 = jax.random.split(key, 4)
        scale = 1.0 / jnp.sqrt(ci)
        params.append(dict(
            w_rel=jax.random.uniform(k1, (num_edge_types, co, ci),
                                     minval=-scale, maxval=scale,
                                     dtype=jnp.float32),
            w_root=jax.random.uniform(k2, (num_node_types, co, ci),
                                      minval=-scale, maxval=scale,
                                      dtype=jnp.float32),
            b_root=jax.random.uniform(k3, (num_node_types, 1, co),
                                      minval=-scale, maxval=scale,
                                      dtype=jnp.float32),
        ))
    return params


def rgcn_forward(params, x_dict, emb_dict, edge_index, edge_type, node_type,
                 local_node_idx, in_channels, num_node_types, num_edge_types,
                 *, a_dtype=jnp.bfloat16, tm=32, tk=128):
    n = node_type.shape[0]
    np_ = _round_up(n, tm)

    # Node features (gather by type), padded to a multiple of the row tile.
    x = group_input(x_dict, emb_dict, node_type, local_node_idx, in_channels)
    x = jnp.pad(x, ((0, np_ - n), (0, 0)))
    node_type_p = jnp.pad(node_type, (0, np_ - n), constant_values=-1)
    nt_onehot = jax.nn.one_hot(node_type_p, num_node_types, dtype=jnp.float32)

    # Dense mean adjacency, interleaved wide layout A_wide[n, m*R + r] = A[r, n, m].
    a = build_mean_adjacency(edge_index, edge_type, np_, num_edge_types)
    a_wide = a.transpose(1, 2, 0).reshape(np_, np_ * num_edge_types)
    kp = _round_up(np_ * num_edge_types, tk)
    a_wide = jnp.pad(a_wide, ((0, 0), (0, kp - np_ * num_edge_types)))
    a_wide = a_wide.astype(a_dtype)          # dominant operand -> bf16 by default

    num_layers = len(params)
    for i, p in enumerate(params):
        x = rgcn_conv_layer(a_wide, x, nt_onehot, p["w_rel"], p["w_root"],
                            p["b_root"], apply_relu=(i != num_layers - 1),
                            a_dtype=a_dtype, tm=tm, tk=tk)
        # TODO(synk): F.dropout(p=0.5) skipped (eval mode / training=False).
    return x[:n]


# Pure-JAX reference of the same math (matches MessagePassing order: A @ (X @ W^T))
def rgcn_forward_ref(params, x_dict, emb_dict, edge_index, edge_type, node_type,
                     local_node_idx, in_channels, num_node_types, num_edge_types):
    n = node_type.shape[0]
    x = group_input(x_dict, emb_dict, node_type, local_node_idx, in_channels)
    a = build_mean_adjacency(edge_index, edge_type, n, num_edge_types)
    nt_onehot = jax.nn.one_hot(node_type, num_node_types, dtype=jnp.float32)
    num_layers = len(params)
    for i, p in enumerate(params):
        c_out = p["w_rel"].shape[1]
        out = jnp.zeros((n, c_out), dtype=jnp.float32)
        for r in range(num_edge_types):
            out = out + a[r] @ (x @ p["w_rel"][r].T)
        for t in range(num_node_types):
            root = x @ p["w_root"][t].T + p["b_root"][t]
            out = out + nt_onehot[:, t:t + 1] * root
        if i != num_layers - 1:
            out = jnp.maximum(out, 0.0)
        x = out
    return x


if __name__ == "__main__":
    key = jax.random.PRNGKey(0)

    # Small shapes consistent with the module
    in_channels, hidden_channels, out_channels = 32, 64, 16
    num_layers = 2
    num_node_types = 3          # node types 0,1 have features; type 2 is embedded
    num_edge_types = 4
    nodes_per_type = (24, 24, 16)
    num_nodes = sum(nodes_per_type)
    num_edges = 256

    node_type = jnp.concatenate([
        jnp.full((c,), t, dtype=jnp.int32) for t, c in enumerate(nodes_per_type)
    ])
    local_node_idx = jnp.concatenate([
        jnp.arange(c, dtype=jnp.int32) for c in nodes_per_type
    ])

    key, k0, k1, k2 = jax.random.split(key, 4)
    x_dict = {
        0: jax.random.normal(k0, (nodes_per_type[0], in_channels), jnp.float32),
        1: jax.random.normal(k1, (nodes_per_type[1], in_channels), jnp.float32),
    }
    emb_dict = {
        2: jax.random.normal(k2, (nodes_per_type[2], in_channels), jnp.float32),
    }

    key, ks, kd, ke = jax.random.split(key, 4)
    src = jax.random.randint(ks, (num_edges,), 0, num_nodes, dtype=jnp.int32)
    dst = jax.random.randint(kd, (num_edges,), 0, num_nodes, dtype=jnp.int32)
    edge_index = jnp.stack([src, dst], axis=0)                 # (2, E)
    edge_type = jax.random.randint(ke, (num_edges,), 0, num_edge_types,
                                   dtype=jnp.int32)

    key, kp = jax.random.split(key)
    params = init_rgcn_params(kp, in_channels, hidden_channels, out_channels,
                              num_layers, num_node_types, num_edge_types)

    args = (params, x_dict, emb_dict, edge_index, edge_type, node_type,
            local_node_idx, in_channels, num_node_types, num_edge_types)

    ref = rgcn_forward_ref(*args)

    # f32 path: tight correctness validation of the fused/tiled kernels.
    out_f32 = rgcn_forward(*args, a_dtype=jnp.float32, tm=32, tk=128)
    out_f32 = jax.block_until_ready(out_f32)
    assert out_f32.shape == (num_nodes, out_channels)
    assert jnp.allclose(out_f32, ref, atol=1e-3, rtol=1e-3)

    # bf16-A/Y path (performance default): sanity tolerance vs f32 reference.
    out_bf16 = rgcn_forward(*args, a_dtype=jnp.bfloat16, tm=32, tk=128)
    out_bf16 = jax.block_until_ready(out_bf16)
    assert out_bf16.shape == (num_nodes, out_channels)
    assert jnp.allclose(out_bf16, ref, atol=1e-1, rtol=1e-1)

    print("KERNEL_OK")
</pallas_src>

<mosaic_0001>
module attributes {stable_mosaic.version = 11 : i64} {
  func.func @_rel_proj_kernel(%arg0: i32, %arg1: memref<32x32xf32, #tpu.memory_space<vmem>>, %arg2: memref<32x512xf32, #tpu.memory_space<vmem>>, %arg3: memref<32x512xf32, #tpu.memory_space<vmem>>) attributes {dimension_semantics = [#tpu.dimension_semantics<parallel>], iteration_bounds = array<i64: 2>, scalar_prefetch = 0 : i64, scratch_operands = 0 : i64, tpu.core_type = #tpu.core_type<tc>, window_params = [{transform_indices = @transform_0, window_bounds = array<i64: 32, 32>}, {pipeline_mode = #tpu.pipeline_mode<synchronous>, transform_indices = @transform_1, window_bounds = array<i64: 32, 512>}, {transform_indices = @transform_2, window_bounds = array<i64: 32, 512>}]} {
    %c0 = arith.constant 0 : index
    %c0_0 = arith.constant 0 : index
    %0 = vector.load %arg1[%c0, %c0_0] : memref<32x32xf32, #tpu.memory_space<vmem>>, vector<32x32xf32>
    %c0_1 = arith.constant 0 : index
    %c0_2 = arith.constant 0 : index
    %1 = vector.load %arg2[%c0_1, %c0_2] : memref<32x512xf32, #tpu.memory_space<vmem>>, vector<32x512xf32>
    %cst = arith.constant dense<0.000000e+00> : vector<32x512xf32>
    %2 = tpu.matmul %0, %1, %cst {dimension_numbers = #tpu.dot_dimension_numbers<[1], [0], [0], [1], [0, 0, 1, 1], [], []>} : vector<32x32xf32>, vector<32x512xf32>, vector<32x512xf32> -> vector<32x512xf32>
    %c0_3 = arith.constant 0 : index
    %c0_4 = arith.constant 0 : index
    %3 = vector.load %arg3[%c0_3, %c0_4] : memref<32x512xf32, #tpu.memory_space<vmem>>, vector<32x512xf32>
    tpu.vector_store %arg3[%c0_3, %c0_4], %2 {strides = array<i32>} : memref<32x512xf32, #tpu.memory_space<vmem>>, vector<32x512xf32>,
    return
  }
  func.func @transform_0(%arg0: i32) -> (i32, i32) {
    %c0_i32 = arith.constant 0 : i32
    %c0_i32_0 = arith.constant 0 : i32
    return %arg0, %c0_i32 : i32, i32
  }
  func.func @transform_1(%arg0: i32) -> (i32, i32) {
    %c0_i32 = arith.constant 0 : i32
    %c0_i32_0 = arith.constant 0 : i32
    %c0_i32_1 = arith.constant 0 : i32
    return %c0_i32, %c0_i32_0 : i32, i32
  }
  func.func @transform_2(%arg0: i32) -> (i32, i32) {
    %c0_i32 = arith.constant 0 : i32
    %c0_i32_0 = arith.constant 0 : i32
    return %arg0, %c0_i32 : i32, i32
  }
}

</mosaic_0001>

<bundles_post_ra>
// kernel: tpu_custom_call.1
= control target key start
LH: loop header
LB: loop body
LE: loop exit
PB: predicated region body
PF: predicated region fallthrough
CT: control target
= control target key end

     0   :  { %7 = vsyncpa [#allocation3], 0  ;;  %s826_s0 = inlined_call_operand.vmem [shape: f32[64,32], index: 0, kind: input, shape index: {}]   ;;  %s827_s1 = inlined_call_operand.hbm [shape: f32[32,512], index: 1, kind: input, shape index: {}]   ;;  %s828_s2 = inlined_call_operand.hbm [shape: f32[64,512], index: 2, kind: output, shape index: {}]  }
   0x1   :  { %8 = vsyncpa [#allocation4], 0 }
   0x2   :  { %10 = vsyncpa [#allocation4 + $0x1], 0  ;;  %s670_s9 = smov 0   ;;  %s672_s10 = smov 0  }
   0x3   :  { %s674_s11 = smov 0   ;;  %s676_s12 = smov 0  }
   0x4 LB: > { %s691_s13 = sadd.s32 4294967295, %s646_s12   ;;  %s476_s14 = sadd.s32 4294967294, %s646_s12   ;;  %s646_s12 = sphi %s676_s12, %s836_s12   ;;  %s642_s11 = sphi %s674_s11, %s835_s11   ;;  %s638_s10 = sphi %s672_s10, %s834_s10   ;;  %s634_s9 = sphi %s670_s9, %s833_s9  }
   0x5   : > { %s695_s15 = sadd.s32 1, %s646_s12   ;;  %s70_s16 = sadd.s32 1, %s642_s11 }
   0x6   : > { %s67_s17 = ssub.s32 %s646_s12, %s695_s15  ;;  %p80_p0 = scmp.ne.s32.totalorder %s642_s11, %s638_s10 }
   0x7   : > { %p68_p1 = scmp.eq.s32.totalorder %s67_s17, 0  ;;  %p81_p2 = scmp.eq.s32.totalorder %s691_s13, 1 }
   0x8   : > { %p86_p3 = scmp.ne.s32.totalorder %s638_s10, %s634_s9  ;;  %p87_p4 = scmp.eq.s32.totalorder %s476_s14, 1 }
   0x9   : > { %s706_s18 = scalar_select %p68_p1, %s642_s11, %s70_s16  }
   0xa   : > { %p708_p5 = por %p81_p2, %p80_p0  ;;  %p712_p6 = por %p87_p4, %p86_p3 }
   0xb   : > { %p477_p7 = scmp.ge.s32.totalorder %s646_s12, 1  ;;  %p94_p8 = scmp.lt.s32.totalorder %s646_s12, 3 }
   0xc   : > { %s830_s20 = scalar_select %p712_p6, 1, 0 }
   0xd   : > { %p515_p9 = scmp.eq.s32.totalorder %s691_s13, 0  ;;  %p719_p10 = pnand %p477_p7, %p94_p8 }
   0xe   : > { %s648_s22 = smov [#allocation2]  }
   0xf   : > { %s106_s23 = sshll.u32 %s648_s22, 4  ;;  %p507_p11 = pneg %p719_p10  ;;  %s107_s23 = int_to_ptr.vmem [resolvable:$true] %s106_s23 }
  0x10   : > { %s567_s24 = scalar_lea.vmem %s107_s23, 2048  ;;  %p575_p3 = scmp.lt.s32.totalorder %s107_s23, %s107_s23 }
  0x11   : > { %p508_p12 = pnand %p515_p9, %p507_p11  ;;  %p568_p0 = scmp.ne.s32.totalorder %s107_s23, %s567_s24 }
  0x12   : > { %p576_p4 = scmp.lt.s32.totalorder %s567_s24, %s567_s24 }
  0x13   : > { %p558_p13 = pneg %p508_p12 }
  0x14   : > { %p577_p6 = por %p576_p4, %p575_p3 }
  0x15   : > { %p570_p1 = pnand %p568_p0, %p558_p13 }
  0x17   : > { %p571_p2 = pneg %p570_p1 }
  0x19   : > { %p578_p7 = pnand %p577_p6, %p571_p2 }
  0x1b   : > { %581 = shalt.err (!%p578_p7)
}
  0x1c   : > { %s649_s25 = smov 512   ;;  %s650_s26 = smov 32  }
  0x1d   : > { %510 = dma.hbm_to_vmem [thread:$0]  (!%p508_p12), %s827_s1, 2048, %s107_s23, [#allocation3], %s649_s25, %s649_s25, %s650_s26  }
  0x1e   : > { %131 = sbr.rel (%p719_p10) target bundleno = 267 (0x10b), region = 28 }
  0x23   : > { %625 = dma.done.wait (%p515_p9), [#allocation3], 2048  }
  0x24   : > { %627 = vsyncadd (%p515_p9), [#allocation3], 4294965248  ;;  %s483_s29 = sshll.u32 %s691_s13, 2  ;;  %v651_v0 = vmov 0.0   ;;  %v177_v1 = vld [vmem:[#allocation2 + $0x68] sm:$0xff]  ;;  %v179_v2 = vld [vmem:[#allocation2 + $0x78] sm:$0xff] }
  0x25   : > { %257 = vmatprep.mubr.f32.mxu0 %v651_v0  ;;  %346 = vmatprep.mubr.f32.mxu1 %v651_v0  ;;  %p154_p6 = scmp.lt.s32.totalorder %s483_s29, 7  ;;  %v176_v3 = vld [vmem:[#allocation2 + $0x60] sm:$0xff]  ;;  %v178_v4 = vld [vmem:[#allocation2 + $0x70] sm:$0xff]  ;;  %v173_v5 = vld [vmem:[#allocation2 + $0x48] sm:$0xff]  ;;  %vm180_vm0 = vcmask 261120   ;;  %s150_s6 = sand.u32 1, %s638_s10  }
  0x26   : > { %217 = vmatprep.subr.mxu0 %v177_v1  ;;  %306 = vmatprep.subr.mxu1 %v179_v2  ;;  %v175_v6 = vld [vmem:[#allocation2 + $0x58] sm:$0xff]  ;;  %v172_v7 = vld [vmem:[#allocation2 + $0x40] sm:$0xff]  ;;  %v174_v8 = vld [vmem:[#allocation2 + $0x50] sm:$0xff]  ;;  %s482_s7 = sshll.u32 %s150_s6, 7  ;;  %s500_s14 = sshll.u32 %s691_s13, 11 }
  0x27   : > { %s838_s29 = smov (!%p154_p6, %s483_s29), 7  ;;  %218 = vmatpush1.msra.mxu0 %v176_v3  ;;  %307 = vmatpush1.msra.mxu1 %v178_v4  ;;  %v169_v9 = vld [vmem:[#allocation2 + $0x28] sm:$0xff]  ;;  %v171_v10 = vld [vmem:[#allocation2 + $0x38] sm:$0xff]  ;;  %v168_v11 = vld [vmem:[#allocation2 + $0x20] sm:$0xff]  ;;  %s757_s8 = scalar_lea.vmem [#allocation5], %s482_s7 }
  0x28   : > { %s484_s30 = sshll.u32 %s838_s29, 3  ;;  %219 = vmatprep.subr.mxu0 %v173_v5  ;;  %308 = vmatprep.subr.mxu1 %v175_v6  ;;  %v170_v12 = vld [vmem:[#allocation2 + $0x30] sm:$0xff]  ;;  %v165_v13 = vld [vmem:[#allocation2 + $0x8] sm:$0xff]  ;;  %v167_v14 = vld [vmem:[#allocation2 + $0x18] sm:$0xff]  ;;  %s402_s16 = sshll.u32 %s757_s8, 4  ;;  %s778_s16 = int_to_ptr.vmem [resolvable:$true] %s402_s16 }
  0x29   : > { %s740_s5 = scalar_lea.vmem %s826_s0, %s484_s30  ;;  %220 = vmatpush1.msra.mxu0 %v172_v7  ;;  %309 = vmatpush1.msra.mxu1 %v174_v8  ;;  %v164_v15 = vld [vmem:[#allocation2] sm:$0xff]  ;;  %v166_v16 = vld [vmem:[#allocation2 + $0x10] sm:$0xff]  ;;  %s776_s22 = scalar_lea.hbm %s828_s2, %s500_s14 }
  0x2a   : > { %221 = vmatprep.subr.mxu0 %v169_v9  ;;  %310 = vmatprep.subr.mxu1 %v171_v10  ;;  %v160_v17 = vld [vmem:[%s740_s5] sm:$0xff]  ;;  %v161_v18 = vld [vmem:[%s740_s5 + $0x8] sm:$0xff]  ;;  %v162_v19 = vld [vmem:[%s740_s5 + $0x10] sm:$0xff]  ;;  %s786_s13 = scalar_lea.sflag [#allocation4], %s150_s6  ;;  %s582_s23 = scalar_lea.vmem %s778_s16, 2048 }
  0x2b   : > { %222 = vmatpush1.msra.mxu0 %v168_v11  ;;  %311 = vmatpush1.msra.mxu1 %v170_v12  ;;  %v163_v20 = vld [vmem:[%s740_s5 + $0x18] sm:$0xff]  ;;  %p583_p8 = scmp.ne.s32.totalorder %s778_s16, %s582_s23  ;;  %s652_s24 = smov [#allocation5]  }
  0x2c   : > { %223 = vmatprep.subr.mxu0 %v165_v13  ;;  %312 = vmatprep.subr.mxu1 %v167_v14  ;;  %s586_s25 = sshll.u32 %s652_s24, 4  ;;  %s587_s25 = int_to_ptr.vmem [resolvable:$false] %s586_s25 }
  0x2d   : > { %224 = vmatpush1.msra.mxu0 %v164_v15  ;;  %313 = vmatpush1.msra.mxu1 %v166_v16  ;;  %p584_p9 = pnand %p583_p8, %p708_p5  ;;  %s588_s26 = scalar_lea.vmem %s587_s25, 4096 }
  0x2e   : > { %485 = vmatmul.mubr.msk.f32.vlgmr.msra.gmra.mxu0 %vm180_vm0, %v160_v17  ;;  %489 = vmatmul.mubr.msk.f32.vlgmr.msra.gmra.mxu1 %vm180_vm0, %v160_v17  ;;  %p589_p11 = scmp.lt.s32.totalorder %s778_s16, %s587_s25  ;;  %p590_p12 = scmp.lt.s32.totalorder %s588_s26, %s582_s23 }
  0x2f   : > { %263 = vmatprep.mubr.f32.mxu0 %v651_v0  ;;  %352 = vmatprep.mubr.f32.mxu1 %v651_v0  ;;  %p585_p10 = pneg %p584_p9 }
  0x30   : > { %p591_p13 = por %p590_p12, %p589_p11 }
  0x32   : > { %486 = vmatmul.mubr.msk.f32.gmra.mxu0 %vm180_vm0, %v161_v18  ;;  %490 = vmatmul.mubr.msk.f32.gmra.mxu1 %vm180_vm0, %v161_v18  ;;  %p592_p0 = pnand %p591_p13, %p585_p10 }
  0x33   : > { %269 = vmatprep.mubr.f32.mxu0 %v651_v0  ;;  %358 = vmatprep.mubr.f32.mxu1 %v651_v0 }
  0x36   : > { %487 = vmatmul.mubr.msk.f32.gmra.mxu0 %vm180_vm0, %v162_v19  ;;  %491 = vmatmul.mubr.msk.f32.gmra.mxu1 %vm180_vm0, %v162_v19 }
  0x37   : > { %275 = vmatprep.mubr.f32.mxu0 %v651_v0  ;;  %364 = vmatprep.mubr.f32.mxu1 %v651_v0 }
  0x3a   : > { %488 = vmatmul.mubr.msk.f32.gmra.mxu0 %vm180_vm0, %v163_v20  ;;  %492 = vmatmul.mubr.msk.f32.gmra.mxu1 %vm180_vm0, %v163_v20 }
  0xee   : > { %v259_v21 = vpop.f32.mrf.mxu0  ;;  %v348_v22 = vpop.f32.mrf.mxu1 }
  0xef   : > { %371 = vst [vmem:[%s757_s8] sm:$0xff] %v259_v21  ;;  %373 = vst [vmem:[%s757_s8 + $0x10] sm:$0xff] %v348_v22 }
  0xf0   : > { %v261_v23 = vpop.f32.mrf.mxu0  ;;  %v350_v24 = vpop.f32.mrf.mxu1 }
  0xf1   : > { %372 = vst [vmem:[%s757_s8 + $0x8] sm:$0xff] %v261_v23  ;;  %374 = vst [vmem:[%s757_s8 + $0x18] sm:$0xff] %v350_v24 }
  0xf2   : > { %v265_v25 = vpop.f32.mrf.mxu0  ;;  %v354_v26 = vpop.f32.mrf.mxu1 }
  0xf3   : > { %375 = vst [vmem:[%s757_s8 + $0x20] sm:$0xff] %v265_v25  ;;  %377 = vst [vmem:[%s757_s8 + $0x30] sm:$0xff] %v354_v26 }
  0xf4   : > { %v267_v27 = vpop.f32.mrf.mxu0  ;;  %v356_v28 = vpop.f32.mrf.mxu1 }
  0xf5   : > { %376 = vst [vmem:[%s757_s8 + $0x28] sm:$0xff] %v267_v27  ;;  %378 = vst [vmem:[%s757_s8 + $0x38] sm:$0xff] %v356_v28 }
  0xf6   : > { %v271_v29 = vpop.f32.mrf.mxu0  ;;  %v360_v30 = vpop.f32.mrf.mxu1 }
  0xf7   : > { %379 = vst [vmem:[%s757_s8 + $0x40] sm:$0xff] %v271_v29  ;;  %381 = vst [vmem:[%s757_s8 + $0x50] sm:$0xff] %v360_v30 }
  0xf8   : > { %v273_v31 = vpop.f32.mrf.mxu0  ;;  %v362_v32 = vpop.f32.mrf.mxu1 }
  0xf9   : > { %380 = vst [vmem:[%s757_s8 + $0x48] sm:$0xff] %v273_v31  ;;  %382 = vst [vmem:[%s757_s8 + $0x58] sm:$0xff] %v362_v32 }
  0xfa   : > { %v277_v33 = vpop.f32.mrf.mxu0  ;;  %v366_v34 = vpop.f32.mrf.mxu1 }
  0xfb   : > { %383 = vst [vmem:[%s757_s8 + $0x60] sm:$0xff] %v277_v33  ;;  %385 = vst [vmem:[%s757_s8 + $0x70] sm:$0xff] %v366_v34 }
  0xfc   : > { %v279_v35 = vpop.f32.mrf.mxu0  ;;  %v368_v36 = vpop.f32.mrf.mxu1 }
  0xfd   : > { %384 = vst [vmem:[%s757_s8 + $0x68] sm:$0xff] %v279_v35  ;;  %386 = vst [vmem:[%s757_s8 + $0x78] sm:$0xff] %v368_v36 }
  0xfe   : > { %595 = shalt.err (!%p592_p0)
}
  0xff   : > { %s596_s27 = scalar_lea.hbm %s776_s22, 2048  ;;  %s600_s30 = scalar_lea.hbm %s828_s2, 4096 }
 0x100   : > { %p597_p1 = scmp.ne.s32.totalorder %s776_s22, %s596_s27  ;;  %p601_p4 = scmp.lt.s32.totalorder %s776_s22, %s828_s2 }
 0x101   : > { %p602_p7 = scmp.lt.s32.totalorder %s600_s30, %s596_s27 }
 0x102   : > { %p598_p2 = pnand %p597_p1, %p708_p5 }
 0x103   : > { %p603_p6 = por %p602_p7, %p601_p4 }
 0x104   : > { %p599_p3 = pneg %p598_p2 }
 0x106   : > { %p604_p8 = pnand %p603_p6, %p599_p3 }
 0x108   : > { %607 = shalt.err (!%p604_p8)
}
 0x109   : > { %s653_s5 = smov 512   ;;  %s654_s6 = smov 32  }
 0x10a   : > { %505 = dma.vmem_to_hbm [thread:$0]  (%p708_p5), %s778_s16, 2048, %s776_s22, %s786_s13, %s653_s5, %s653_s5, %s654_s6  }
 0x10b PF: > { %p517_p9 = scmp.ge.s32.totalorder %s646_s12, 2  ;;  %s417_s7 = sand.u32 1, %s634_s9  }
 0x10c   : > { %p832_p10 = scmp.ne.s32.totalorder %s830_s20, 0  ;;  %s418_s8 = scalar_lea.sflag [#allocation4], %s417_s7 }
 0x10e   : > { %p512_p11 = pnand %p517_p9, %p832_p10 }
 0x110   : > { %p513_p12 = pneg %p512_p11 }
 0x112   : > { %629 = dma.done.wait (%p513_p12), %s418_s8, 2048  }
 0x113   : > { %631 = vsyncadd (%p513_p12), %s418_s8, 4294965248  ;;  %p13_p13 = scmp.ge.s32.totalorder %s695_s15, 4   ;;  %s833_s9 = smov %s638_s10 }
 0x114   : > { %s834_s10 = smov %s642_s11  ;;  %s835_s11 = smov %s706_s18 }
 0x115   : > { %s836_s12 = smov %s695_s15  ;;  %15 = sbr.rel (!%p13_p13) target bundleno = 4 (0x4), region = 68 }
 0x11a   :  { %423 = vsyncpa [#allocation3], 1 }
 0x11b   :  { %425 = vsyncpa [#allocation3 + $0x1], 1 }
 0x11c   :  { %426 = vsyncpa [#allocation4], 1 }
 0x11d   :  { %428 = vsyncpa [#allocation4 + $0x1], 1 }

</bundles_post_ra>
